<compile_context>
chip_gen: v6e
topology: v6e:2x2x1
jax: 0.10.0
libtpu: 0.0.40
codegen_flags: <defaults>
</compile_context>

<pallas_src>
import numpy as np
import jax
import jax.numpy as jnp
from jax import lax
from jax.experimental import pallas as pl
from jax.experimental.pallas import tpu as pltpu


def _cdiv(a, b):
    return -(-a // b)


def _round_up(a, b):
    return _cdiv(a, b) * b


def _make_kernel(W, HW_pad, BP, P_true, P_pad):
    eps2 = 0.001 ** 2  # Python float -> folded as a literal (no capture)

    def kernel(m_ref, x_ref, o_ref):
        # m_ref : (2, HW_pad) f32 masks (row 0: H-grad validity, row 1: W-grad)
        # x_ref : (BP, HW_pad) block of flattened planes (native dtype)
        # o_ref : (1, 2, HW_pad) per-block, per-lane partial sums
        xr = x_ref[...]

        # Lane rotations (XLU) bring x[(c+1) % HWp] and x[(c+W) % HWp] to
        # lane c; wrap / padding lanes are killed by the static masks below.
        # Roll in the native (possibly packed bf16) dtype, cast afterwards.
        x_p1 = pltpu.roll(xr, HW_pad - 1, 1).astype(jnp.float32)
        x_pW = pltpu.roll(xr, HW_pad - W, 1).astype(jnp.float32)
        x = xr.astype(jnp.float32)

        gh = x_pW - x      # across-row (H) gradient; garbage where mask_h == 0
        gw = x_p1 - x      # within-row (W) gradient; garbage where mask_w == 0

        rh = jnp.sqrt(gh * gh + eps2) * m_ref[0:1, :]
        rw = jnp.sqrt(gw * gw + eps2) * m_ref[1:2, :]

        if P_pad != P_true:  # static: kill contributions of padded planes
            row = (lax.broadcasted_iota(jnp.int32, (BP, HW_pad), 0)
                   + pl.program_id(0) * BP)
            valid = row < P_true
            rh = jnp.where(valid, rh, 0.0)
            rw = jnp.where(valid, rw, 0.0)

        # Per-lane partial sums: sublane-only reduce (VALU vreg adds + one
        # small intra-vreg reduce); no cross-lane XLU reduce, no broadcast.
        o_ref[:, 0:1, :] = jnp.sum(rh, axis=0, keepdims=True)[None]
        o_ref[:, 1:2, :] = jnp.sum(rw, axis=0, keepdims=True)[None]

    return kernel


def smooth_loss(uv, edge_constant=150.0, *,
                block_target_bytes=4 * 1024 * 1024,
                single_block_max_bytes=256 * 1024):
    """uv: (N, C, H, W) float array. Returns scalar float32 loss.

    NOTE: edge_constant is unused in the reference forward pass (parity only).
    Planes are streamed whole (not tiled along H*W); fine for planes up to a
    few MiB each, which covers realistic flow-field sizes.
    """
    N, C, H, W = uv.shape
    P = N * C
    HW = H * W
    HW_pad = _round_up(HW, 128)          # lane-dense, full vregs

    x = uv.reshape(P, HW)
    if HW_pad != HW:
        x = jnp.pad(x, ((0, 0), (0, HW_pad - HW)))

    # ---- block / grid selection -------------------------------------------
    plane_bytes = HW_pad * x.dtype.itemsize
    total_bytes = P * plane_bytes
    if total_bytes <= single_block_max_bytes or P < 16:
        # Tiny problem: one resident block; pipelining overhead not worth it.
        BP, grid = P, 1
    else:
        # Stream planes in ~block_target_bytes blocks so the Pallas pipeline
        # overlaps HBM DMA with compute. Keep >= 2 blocks and an even grid so
        # the "parallel" plane axis can shard across both v7x TensorCores.
        BP = max(8, (block_target_bytes // plane_bytes) // 8 * 8)
        grid = max(2, _cdiv(P, BP))
        if grid % 2:
            grid += 1
        BP = max(8, _round_up(_cdiv(P, grid), 8))
    P_pad = BP * grid
    if P_pad != P:
        x = jnp.pad(x, ((0, P_pad - P), (0, 0)))

    # ---- static gradient-validity masks over the flattened lane axis ------
    col = np.arange(HW_pad)
    mask_h = (col < (H - 1) * W).astype(np.float32)                     # roll-by-W valid
    mask_w = (((col % W) != (W - 1)) & (col < HW)).astype(np.float32)   # roll-by-1 valid
    masks = jnp.asarray(np.stack([mask_h, mask_w]))                     # (2, HW_pad)

    kernel = _make_kernel(W, HW_pad, BP, P, P_pad)

    out = pl.pallas_call(
        kernel,
        out_shape=jax.ShapeDtypeStruct((grid, 2, HW_pad), jnp.float32),
        grid_spec=pltpu.PrefetchScalarGridSpec(
            num_scalar_prefetch=0,
            grid=(grid,),
            in_specs=[
                pl.BlockSpec((2, HW_pad), lambda i: (0, 0)),     # masks (resident)
                pl.BlockSpec((BP, HW_pad), lambda i: (i, 0)),    # planes (streamed)
            ],
            out_specs=pl.BlockSpec((1, 2, HW_pad), lambda i: (i, 0, 0)),
        ),
        compiler_params=pltpu.CompilerParams(
            dimension_semantics=("parallel",),
            vmem_limit_bytes=32 * 1024 * 1024,
        ),
        cost_estimate=pl.CostEstimate(
            flops=10 * P_pad * HW_pad,
            transcendentals=2 * P_pad * HW_pad,
            bytes_accessed=(P_pad * HW_pad * x.dtype.itemsize
                            + 8 * HW_pad
                            + grid * 2 * HW_pad * 4),
        ),
    )(masks, x)

    # Final combine + normalization in the wrapper (true element counts).
    sum_h = jnp.sum(out[:, 0, :], dtype=jnp.float32)
    sum_w = jnp.sum(out[:, 1, :], dtype=jnp.float32)
    n_h = jnp.float32(P * (H - 1) * W)
    n_w = jnp.float32(P * H * (W - 1))
    return (sum_h / n_h + sum_w / n_w) * jnp.float32(0.5)


def smooth_loss_ref(uv):
    gh = uv[:, :, 1:, :] - uv[:, :, :-1, :]
    gw = uv[:, :, :, 1:] - uv[:, :, :, :-1]
    eps = jnp.float32(0.001)
    r = lambda v: jnp.sqrt(v * v + eps * eps)
    return (jnp.mean(r(gh)) + jnp.mean(r(gw))) / 2.0


if __name__ == "__main__":
    key = jax.random.PRNGKey(0)

    # Primary shape implied by the module (N, C, H, W).
    uv = jax.random.normal(key, (2, 4, 16, 16), dtype=jnp.float32)
    loss = jax.block_until_ready(smooth_loss(uv))
    ref = smooth_loss_ref(uv)
    assert jnp.allclose(loss, ref, rtol=1e-5, atol=1e-6), (loss, ref)

    # Non-square H != W with lane padding (H*W = 240 -> 256): pins the roll
    # direction / mask convention.
    uv2 = jax.random.normal(jax.random.PRNGKey(1), (2, 3, 12, 20),
                            dtype=jnp.float32)
    loss2 = jax.block_until_ready(smooth_loss(uv2))
    ref2 = smooth_loss_ref(uv2)
    assert jnp.allclose(loss2, ref2, rtol=1e-5, atol=1e-6), (loss2, ref2)

    # Force the multi-block (pipelined, even-grid) path with plane padding.
    uv3 = jax.random.normal(jax.random.PRNGKey(2), (3, 9, 16, 16),
                            dtype=jnp.float32)
    loss3 = jax.block_until_ready(
        smooth_loss(uv3, block_target_bytes=8 * 1024,
                    single_block_max_bytes=0))
    ref3 = smooth_loss_ref(uv3)
    assert jnp.allclose(loss3, ref3, rtol=1e-5, atol=1e-6), (loss3, ref3)

    print("KERNEL_OK")
</pallas_src>

<mosaic_0001>
module attributes {stable_mosaic.version = 11 : i64} {
  func.func @kernel(%arg0: i32, %arg1: memref<2x256xf32, #tpu.memory_space<vmem>>, %arg2: memref<8x256xf32, #tpu.memory_space<vmem>>, %arg3: memref<1x2x256xf32, #tpu.memory_space<vmem>>) attributes {dimension_semantics = [#tpu.dimension_semantics<parallel>], iteration_bounds = array<i64: 1>, scalar_prefetch = 0 : i64, scratch_operands = 0 : i64, tpu.core_type = #tpu.core_type<tc>, window_params = [{pipeline_mode = #tpu.pipeline_mode<synchronous>, transform_indices = @transform_0, window_bounds = array<i64: 2, 256>}, {transform_indices = @transform_1, window_bounds = array<i64: 8, 256>}, {transform_indices = @transform_2, window_bounds = array<i64: 1, 2, 256>}]} {
    %c0 = arith.constant 0 : index
    %c0_0 = arith.constant 0 : index
    %0 = vector.load %arg2[%c0, %c0_0] : memref<8x256xf32, #tpu.memory_space<vmem>>, vector<8x256xf32>
    %c255_i32 = arith.constant 255 : i32
    %1 = tpu.dynamic_rotate %0 by %c255_i32 dim 1 : vector<8x256xf32>, i32 -> vector<8x256xf32>
    %c240_i32 = arith.constant 240 : i32
    %2 = tpu.dynamic_rotate %0 by %c240_i32 dim 1 : vector<8x256xf32>, i32 -> vector<8x256xf32>
    %3 = arith.subf %2, %0 : vector<8x256xf32>
    %4 = arith.subf %1, %0 : vector<8x256xf32>
    %5 = arith.mulf %3, %3 : vector<8x256xf32>
    %cst = arith.constant 9.99999997E-7 : f32
    %6 = vector.broadcast %cst : f32 to vector<8x256xf32>
    %7 = arith.addf %5, %6 : vector<8x256xf32>
    %8 = math.sqrt %7 : vector<8x256xf32>
    %c0_1 = arith.constant 0 : index
    %c0_2 = arith.constant 0 : index
    %9 = vector.load %arg1[%c0_1, %c0_2] : memref<2x256xf32, #tpu.memory_space<vmem>>, vector<1x256xf32>
    %10 = vector.broadcast %9 : vector<1x256xf32> to vector<8x256xf32>
    %11 = arith.mulf %8, %10 : vector<8x256xf32>
    %12 = arith.mulf %4, %4 : vector<8x256xf32>
    %cst_3 = arith.constant 9.99999997E-7 : f32
    %13 = vector.broadcast %cst_3 : f32 to vector<8x256xf32>
    %14 = arith.addf %12, %13 : vector<8x256xf32>
    %15 = math.sqrt %14 : vector<8x256xf32>
    %c1 = arith.constant 1 : index
    %c0_4 = arith.constant 0 : index
    %16 = vector.load %arg1[%c1, %c0_4] : memref<2x256xf32, #tpu.memory_space<vmem>>, vector<1x256xf32>
    %17 = vector.broadcast %16 : vector<1x256xf32> to vector<8x256xf32>
    %18 = arith.mulf %15, %17 : vector<8x256xf32>
    %cst_5 = arith.constant dense<0.000000e+00> : vector<256xf32>
    %19 = vector.multi_reduction <add>, %11, %cst_5 [0] : vector<8x256xf32> to vector<256xf32>
    %20 = vector.shape_cast %19 : vector<256xf32> to vector<1x256xf32>
    %21 = vector.shape_cast %20 : vector<1x256xf32> to vector<1x1x256xf32>
    %c0_6 = arith.constant 0 : index
    %c0_7 = arith.constant 0 : index
    %c0_8 = arith.constant 0 : index
    %22 = vector.load %arg3[%c0_6, %c0_7, %c0_8] : memref<1x2x256xf32, #tpu.memory_space<vmem>>, vector<1x1x256xf32>
    tpu.vector_store %arg3[%c0_6, %c0_7, %c0_8], %21 {strides = array<i32>} : memref<1x2x256xf32, #tpu.memory_space<vmem>>, vector<1x1x256xf32>,
    %cst_9 = arith.constant dense<0.000000e+00> : vector<256xf32>
    %23 = vector.multi_reduction <add>, %18, %cst_9 [0] : vector<8x256xf32> to vector<256xf32>
    %24 = vector.shape_cast %23 : vector<256xf32> to vector<1x256xf32>
    %25 = vector.shape_cast %24 : vector<1x256xf32> to vector<1x1x256xf32>
    %c0_10 = arith.constant 0 : index
    %c1_11 = arith.constant 1 : index
    %c0_12 = arith.constant 0 : index
    %26 = vector.load %arg3[%c0_10, %c1_11, %c0_12] : memref<1x2x256xf32, #tpu.memory_space<vmem>>, vector<1x1x256xf32>
    tpu.vector_store %arg3[%c0_10, %c1_11, %c0_12], %25 {strides = array<i32>} : memref<1x2x256xf32, #tpu.memory_space<vmem>>, vector<1x1x256xf32>,
    return
  }
  func.func @transform_0(%arg0: i32) -> (i32, i32) {
    %c0_i32 = arith.constant 0 : i32
    %c0_i32_0 = arith.constant 0 : i32
    %c0_i32_1 = arith.constant 0 : i32
    return %c0_i32, %c0_i32_0 : i32, i32
  }
  func.func @transform_1(%arg0: i32) -> (i32, i32) {
    %c0_i32 = arith.constant 0 : i32
    %c0_i32_0 = arith.constant 0 : i32
    return %arg0, %c0_i32 : i32, i32
  }
  func.func @transform_2(%arg0: i32) -> (i32, i32, i32) {
    %c0_i32 = arith.constant 0 : i32
    %c0_i32_0 = arith.constant 0 : i32
    %c0_i32_1 = arith.constant 0 : i32
    return %arg0, %c0_i32, %c0_i32_0 : i32, i32, i32
  }
}

</mosaic_0001>

<bundles_post_ra>
// kernel: tpu_custom_call.1
= control target key start
LH: loop header
LB: loop body
LE: loop exit
PB: predicated region body
PF: predicated region fallthrough
CT: control target
= control target key end

     0   :  { %7 = vsyncpa [#allocation3], 0  ;;  %s325_s0 = inlined_call_operand.hbm [shape: f32[2,256], index: 0, kind: input, shape index: {}]   ;;  %s326_s1 = inlined_call_operand.hbm [shape: f32[8,256], index: 1, kind: input, shape index: {}]   ;;  %s327_s2 = inlined_call_operand.hbm [shape: f32[1,2,256], index: 2, kind: output, shape index: {}]  }
   0x1   :  { %8 = vsyncpa [#allocation6], 0 }
   0x2   :  { %9 = vsyncpa [#allocation4], 0  ;;  %s286_s9 = smov [#allocation2]   ;;  %s287_s11 = smov [#allocation5]  }
   0x3   :  { %s16_s10 = sshll.u32 %s286_s9, 4  ;;  %s26_s12 = sshll.u32 %s287_s11, 4  ;;  %s17_s10 = int_to_ptr.vmem [resolvable:$true] %s16_s10  ;;  %s27_s12 = int_to_ptr.vmem [resolvable:$true] %s26_s12 }
   0x4   :  { %s228_s13 = scalar_lea.vmem %s17_s10, 64  ;;  %p233_p1 = scmp.lt.s32.totalorder %s17_s10, %s17_s10 }
   0x5   :  { %p229_p0 = scmp.ne.s32.totalorder %s17_s10, %s228_s13  ;;  %p234_p2 = scmp.lt.s32.totalorder %s228_s13, %s228_s13 }
   0x7   :  { %p235_p3 = por %p234_p2, %p233_p1 }
   0x9   :  { %p236_p4 = pnand %p235_p3, %p229_p0 }
   0xb   :  { %239 = shalt.err (!%p236_p4)
}
   0xc   :  { %19 = dma.hbm_to_vmem [thread:$0]  %s325_s0, 64, %s17_s10, [#allocation3]  }
   0xd   :  { %s248_s16 = scalar_lea.vmem %s27_s12, 256  ;;  %p253_p6 = scmp.lt.s32.totalorder %s27_s12, %s27_s12 }
   0xe   :  { %p249_p5 = scmp.ne.s32.totalorder %s27_s12, %s248_s16  ;;  %p254_p7 = scmp.lt.s32.totalorder %s248_s16, %s248_s16 }
  0x10   :  { %p255_p8 = por %p254_p7, %p253_p6 }
  0x12   :  { %p256_p9 = pnand %p255_p8, %p249_p5 }
  0x14   :  { %259 = shalt.err (!%p256_p9)
}
  0x15   :  { %29 = dma.hbm_to_vmem [thread:$0]  %s326_s1, 256, %s27_s12, [#allocation6]  }
  0x16   :  { %280 = dma.done.wait [#allocation3], 64  }
  0x17   :  { %281 = vsyncadd [#allocation3], 4294967232 }
  0x18   :  { %282 = dma.done.wait [#allocation6], 256  }
  0x19   :  { %283 = vsyncadd [#allocation6], 4294967040  ;;  %v36_v0 = vld [vmem:[#allocation5] sm:$0xff]  ;;  %s288_s19 = smov 112   ;;  %s289_s20 = smov 127   ;;  %v37_v1 = vld [vmem:[#allocation5 + $0x8] sm:$0xff]  ;;  %v42_v2 = vlaneseq }
  0x1a   :  { %47 = vrot.lane.b32.xlu1 %v36_v0, %s288_s19  ;;  %38 = vrot.lane.b32.xlu0 %v36_v0, %s289_s20  ;;  %v76_v26 = vld [vmem:[#allocation2] ss:$2 sm:$0x3]  ;;  %v109_v28 = vld [vmem:[#allocation2 + $0x1] ss:$2 sm:$0x3] }
  0x1b   :  { %v43_v3 = vand.u32 127, %v42_v2  ;;  %v315_v24 = vshrl.u32 %v42_v2, 7  ;;  %v290_v62 = vmov 1966171168   ;;  %vm155_vm10 = vcmp.lt.s32.totalorder %v42_v2, 256  ;;  %s291_s0 = smov [#allocation7]  }
  0x1c   :  { %v139_v63 = vunpack.c.l.s4 %v290_v62  ;;  %s196_s1 = sshll.u32 %s291_s0, 4  ;;  %s197_s1 = int_to_ptr.vmem [resolvable:$true] %s196_s1 }
  0x1d   :  { %vm51_vm0 = vcmp.lt.s32.totalorder %v43_v3, 112  ;;  %vm44_vm1 = vcmp.lt.s32.totalorder %v43_v3, 127  ;;  %v80_v25 = vsub.s32 0, %v315_v24  ;;  %v84_v27 = vsub.s32 1, %v315_v24  ;;  %s260_s21 = scalar_lea.vmem %s197_s1, 64  ;;  %p265_p11 = scmp.lt.s32.totalorder %s197_s1, %s197_s1 }
  0x1e   :  { %49 = vrot.lane.b32.xlu1 %v37_v1, %s288_s19  ;;  %40 = vrot.lane.b32.xlu0 %v37_v1, %s289_s20  ;;  %p261_p10 = scmp.ne.s32.totalorder %s197_s1, %s260_s21  ;;  %p266_p12 = scmp.lt.s32.totalorder %s260_s21, %s260_s21 }
  0x1f   :  { %v81_v29 = vrot.slane %v76_v26, %v80_v25  ;;  %v85_v31 = vrot.slane %v76_v26, %v84_v27  ;;  %v114_v32 = vrot.slane %v109_v28, %v80_v25  ;;  %v118_v33 = vrot.slane %v109_v28, %v84_v27 }
  0x20   :  { %p267_p13 = por %p266_p12, %p265_p11 }
  0x22   :  { %p268_p0 = pnand %p267_p13, %p261_p10 }
  0x8c   :  { %v48_v4 = vpop.permute.xlu1 %47  ;;  %v39_v5 = vpop.permute.xlu0 %38 }
  0x90   :  { %v50_v6 = vpop.permute.xlu1 %49  ;;  %v41_v7 = vpop.permute.xlu0 %40 }
  0x91   :  { %v52_v8 = vsel %vm51_vm0, %v48_v4, %v50_v6  ;;  %v53_v9 = vsel %vm51_vm0, %v50_v6, %v48_v4  ;;  %v45_v10 = vsel %vm44_vm1, %v39_v5, %v41_v7  ;;  %v46_v11 = vsel %vm44_vm1, %v41_v7, %v39_v5 }
  0x92   :  { %v54_v12 = vsub.f32 %v52_v8, %v36_v0  ;;  %v55_v13 = vsub.f32 %v53_v9, %v37_v1  ;;  %v56_v14 = vsub.f32 %v45_v10, %v36_v0  ;;  %v57_v15 = vsub.f32 %v46_v11, %v37_v1 }
  0x93   :  { %v140_v9 = vunpack.c.0.s8 %v139_v63 }
  0x94   :  { %v58_v16 = vmul.f32 %v54_v12, %v54_v12  ;;  %v59_v17 = vmul.f32 %v55_v13, %v55_v13  ;;  %v90_v18 = vmul.f32 %v56_v14, %v56_v14  ;;  %v91_v19 = vmul.f32 %v57_v15, %v57_v15 }
  0x96   :  { %v60_v20 = vadd.f32 1e-06, %v58_v16  ;;  %v61_v21 = vadd.f32 1e-06, %v59_v17  ;;  %v92_v22 = vadd.f32 1e-06, %v90_v18  ;;  %v143_v18 = vsub.s32 %v140_v9, %v315_v24 }
  0x97   :  { %v93_v23 = vadd.f32 1e-06, %v91_v19 }
  0x98   :  { %212 = vrsqrt.f32 %v60_v20  ;;  %vm64_vm2 = vcmp.eq.f32.partialorder %v60_v20, inf  ;;  %vm66_vm3 = vcmp.eq.f32.partialorder %v60_v20, 0.0  ;;  %v67_v36 = vand.u32 2147483648, %v60_v20 }
  0x99   :  { %214 = vrsqrt.f32 %v61_v21  ;;  %vm71_vm4 = vcmp.eq.f32.partialorder %v61_v21, inf  ;;  %vm73_vm5 = vcmp.eq.f32.partialorder %v61_v21, 0.0  ;;  %v74_v39 = vand.u32 2147483648, %v61_v21 }
  0x9a   :  { %216 = vrsqrt.f32 %v92_v22  ;;  %vm96_vm6 = vcmp.eq.f32.partialorder %v92_v22, inf  ;;  %vm98_vm7 = vcmp.eq.f32.partialorder %v92_v22, 0.0  ;;  %v99_v43 = vand.u32 2147483648, %v92_v22 }
  0x9b   :  { %218 = vrsqrt.f32 %v93_v23  ;;  %vm103_vm8 = vcmp.eq.f32.partialorder %v93_v23, inf  ;;  %v106_v48 = vand.u32 2147483648, %v93_v23  ;;  %vm105_vm9 = vcmp.eq.f32.partialorder %v93_v23, 0.0 }
  0xa5   :  { %v213_v30 = vpop.eup %212 }
  0xa6   :  { %v215_v34 = vpop.eup %214  ;;  %v63_v35 = vmul.f32 %v213_v30, %v60_v20 }
  0xa7   :  { %v217_v37 = vpop.eup %216  ;;  %v70_v38 = vmul.f32 %v215_v34, %v61_v21 }
  0xa8   :  { %v219_v40 = vpop.eup %218  ;;  %v65_v41 = vsel %vm64_vm2, %v60_v20, %v63_v35  ;;  %v95_v42 = vmul.f32 %v217_v37, %v92_v22 }
  0xa9   :  { %v72_v44 = vsel %vm71_vm4, %v61_v21, %v70_v38  ;;  %v102_v45 = vmul.f32 %v219_v40, %v93_v23  ;;  %v68_v46 = vsel %vm66_vm3, %v67_v36, %v65_v41 }
  0xaa   :  { %v97_v47 = vsel %vm96_vm6, %v92_v22, %v95_v42  ;;  %v75_v49 = vsel %vm73_vm5, %v74_v39, %v72_v44  ;;  %v88_v50 = vmul.f32 %v81_v29, %v68_v46 }
  0xab   :  { %v104_v51 = vsel %vm103_vm8, %v93_v23, %v102_v45  ;;  %v89_v52 = vmul.f32 %v85_v31, %v75_v49  ;;  %v100_v53 = vsel %vm98_vm7, %v99_v43, %v97_v47 }
  0xac   :  { %v107_v54 = vsel %vm105_vm9, %v106_v48, %v104_v51  ;;  %v121_v55 = vmul.f32 %v114_v32, %v100_v53  ;;  %v123_v56 = vrot.slane %v88_v50, 4 }
  0xad   :  { %v122_v57 = vmul.f32 %v118_v33, %v107_v54  ;;  %v129_v58 = vrot.slane %v89_v52, 4 }
  0xae   :  { %v124_v59 = vadd.f32 %v123_v56, %v88_v50  ;;  %v158_v60 = vrot.slane %v121_v55, 4 }
  0xaf   :  { %v130_v61 = vadd.f32 %v129_v58, %v89_v52  ;;  %v164_v0 = vrot.slane %v122_v57, 4 }
  0xb0   :  { %v125_v1 = vrot.slane %v124_v59, 2  ;;  %v159_v3 = vadd.f32 %v158_v60, %v121_v55 }
  0xb1   :  { %v131_v4 = vrot.slane %v130_v61, 2  ;;  %v165_v5 = vadd.f32 %v164_v0, %v122_v57 }
  0xb2   :  { %v126_v6 = vadd.f32 %v125_v1, %v124_v59  ;;  %v160_v7 = vrot.slane %v159_v3, 2 }
  0xb3   :  { %v132_v8 = vadd.f32 %v131_v4, %v130_v61  ;;  %v166_v10 = vrot.slane %v165_v5, 2 }
  0xb4   :  { %v127_v11 = vrot.slane %v126_v6, 1  ;;  %v161_v12 = vadd.f32 %v160_v7, %v159_v3 }
  0xb5   :  { %v133_v13 = vrot.slane %v132_v8, 1  ;;  %v167_v14 = vadd.f32 %v166_v10, %v165_v5 }
  0xb6   :  { %v128_v15 = vadd.f32 %v127_v11, %v126_v6  ;;  %v162_v16 = vrot.slane %v161_v12, 1 }
  0xb7   :  { %v134_v17 = vadd.f32 %v133_v13, %v132_v8  ;;  %v168_v19 = vrot.slane %v167_v14, 1 }
  0xb8   :  { %v163_v20 = vadd.f32 %v162_v16, %v161_v12 }
  0xb9   :  { %v137_v21 = vcombine.low %v128_v15, %v134_v17  ;;  %v169_v22 = vadd.f32 %v168_v19, %v167_v14 }
  0xbb   :  { %v144_v23 = vrot.slane %v137_v21, %v143_v18  ;;  %v172_v25 = vcombine.low %v163_v20, %v169_v22 }
  0xbd   :  { %v151_v26 = vrot.slane %v144_v23, %v143_v18  ;;  %v179_v27 = vrot.slane %v172_v25, %v143_v18 }
  0xbf   :  { %157 = vst.msk [vmem:[#allocation7] ss:$2 sm:$0x3] %vm155_vm10, %v151_v26  ;;  %v186_v28 = vrot.slane %v179_v27, %v143_v18 }
  0xc1   :  { %189 = vst.msk [vmem:[#allocation7 + $0x1] ss:$2 sm:$0x3] %vm155_vm10, %v186_v28 }
  0xc2   :  { %271 = shalt.err (!%p268_p0)
}
  0xc3   :  { %199 = dma.vmem_to_hbm [thread:$0]  %s197_s1, 64, %s327_s2, [#allocation4]  }
  0xc4   :  { %284 = dma.done.wait [#allocation4], 64  }
  0xc5   :  { %285 = vsyncadd [#allocation4], 4294967232 }
  0xc6   :  { %203 = vsyncpa [#allocation3], 1 }
  0xc7   :  { %204 = vsyncpa [#allocation6], 1 }
  0xc8   :  { %205 = vsyncpa [#allocation4], 1 }

</bundles_post_ra>
